<compile_context>
chip_gen: v7x
topology: tpu7x:2x2x1
jax: 0.10.0
libtpu: 0.0.40
codegen_flags: <defaults>
</compile_context>

<pallas_src>
import functools

import jax
import jax.numpy as jnp
from jax.experimental import pallas as pl
from jax.experimental.pallas import tpu as pltpu

LANE = 128


def _round_up(v, m):
    return ((v + m - 1) // m) * m


def _pad2d(a, rows, cols):
    return jnp.pad(a, ((0, rows - a.shape[0]), (0, cols - a.shape[1])))


# ------------------------------- Pallas kernel ------------------------------- #

def gin_fused_kernel(adj_ref, x0_ref, w1_ref, b1_ref, w2_ref, b2_ref,
                     o_ref, x_res):
    """Whole GIN forward. Grid axis 0 = layer index (conv layers ..., final MLP)."""
    layer = pl.program_id(0)
    last = pl.num_programs(0) - 1

    @pl.when(layer == 0)
    def _init():
        # Load the input node features into the resident VMEM scratch once.
        x_res[...] = x0_ref[...]

    @pl.when(layer < last)
    def _conv():
        x = x_res[...]
        # bf16 -> f32 upcast is exact (small integer multiplicities); keeps math in f32.
        adj = adj_ref[...].astype(jnp.float32)
        z = jnp.dot(adj, x, preferred_element_type=jnp.float32)          # (A + I) @ x
        h = jnp.dot(z, w1_ref[0], preferred_element_type=jnp.float32) + b1_ref[0]
        h = jnp.maximum(h, 0.0)                                          # BN folded into W1/b1
        y = jnp.dot(h, w2_ref[0], preferred_element_type=jnp.float32) + b2_ref[0]
        x_res[...] = jnp.maximum(y, 0.0)                                 # GIN.forward's .relu()

    @pl.when(layer == last)
    def _final_mlp():
        x = x_res[...]
        h = jnp.dot(x, w1_ref[0], preferred_element_type=jnp.float32) + b1_ref[0]
        h = jnp.maximum(h, 0.0)
        o_ref[...] = jnp.dot(h, w2_ref[0], preferred_element_type=jnp.float32) + b2_ref[0]


# ------------------------------- glue / wrapper ------------------------------- #

def fold_batchnorm(gamma, beta, running_mean, running_var, eps=1e-5):
    scale = gamma / jnp.sqrt(running_var + eps)
    shift = beta - running_mean * scale
    return scale, shift


def init_gin_params(key, in_channels, hidden_channels, out_channels, num_layers):
    params = {"convs": []}
    c_in = in_channels
    for _ in range(num_layers):
        key, k1, k2, k3, k4, k5, k6 = jax.random.split(key, 7)
        layer = {
            "w1": jax.random.normal(k1, (c_in, hidden_channels), jnp.float32) * 0.1,
            "b1": jax.random.normal(k2, (1, hidden_channels), jnp.float32) * 0.1,
            "gamma": 1.0 + 0.1 * jax.random.normal(k3, (hidden_channels,), jnp.float32),
            "beta": 0.1 * jax.random.normal(k4, (hidden_channels,), jnp.float32),
            "mean": jnp.zeros((hidden_channels,), jnp.float32),
            "var": jnp.ones((hidden_channels,), jnp.float32),
            "w2": jax.random.normal(k5, (hidden_channels, hidden_channels), jnp.float32) * 0.1,
            "b2": jax.random.normal(k6, (1, hidden_channels), jnp.float32) * 0.1,
        }
        params["convs"].append(layer)
        c_in = hidden_channels

    key, k1, k2, k3, k4, k5, k6 = jax.random.split(key, 7)
    params["mlp"] = {
        "w1": jax.random.normal(k1, (hidden_channels, hidden_channels), jnp.float32) * 0.1,
        "b1": jax.random.normal(k2, (1, hidden_channels), jnp.float32) * 0.1,
        "gamma": 1.0 + 0.1 * jax.random.normal(k3, (hidden_channels,), jnp.float32),
        "beta": 0.1 * jax.random.normal(k4, (hidden_channels,), jnp.float32),
        "mean": jnp.zeros((hidden_channels,), jnp.float32),
        "var": jnp.ones((hidden_channels,), jnp.float32),
        "w2": jax.random.normal(k5, (hidden_channels, out_channels), jnp.float32) * 0.1,
        "b2": jax.random.normal(k6, (1, out_channels), jnp.float32) * 0.1,
    }
    return params


@functools.partial(jax.jit, static_argnames=("num_nodes", "out_channels"))
def gin_forward(params, x, edge_index, *, num_nodes, out_channels):
    N = num_nodes
    layers = list(params["convs"]) + [params["mlp"]]
    num_steps = len(layers)                     # conv layers + final MLP
    in_channels = x.shape[1]
    hidden = params["convs"][0]["w1"].shape[1]
    C = _round_up(max(in_channels, hidden, out_channels), LANE)   # lane-dense channel width

    # Dense adjacency with the GIN self term folded in:
    #   A_hat[dst, src] = #edges src->dst (+1 on the diagonal), so z = A_hat @ x.
    src, dst = edge_index[0], edge_index[1]
    adj = jnp.zeros((N, N), jnp.float32).at[dst, src].add(1.0)
    adj = adj + jnp.eye(N, dtype=jnp.float32)
    adj = adj.astype(jnp.bfloat16)              # exact for small integer multiplicities

    # Fold eval-mode BatchNorm into the hidden Linear and zero-pad everything to lane width.
    w1s, b1s, w2s, b2s = [], [], [], []
    for lyr in layers:
        scale, shift = fold_batchnorm(lyr["gamma"], lyr["beta"], lyr["mean"], lyr["var"])
        w1 = lyr["w1"] * scale[None, :]
        b1 = lyr["b1"] * scale[None, :] + shift[None, :]
        w1s.append(_pad2d(w1, C, C))
        b1s.append(_pad2d(b1, 1, C))
        w2s.append(_pad2d(lyr["w2"], C, C))
        b2s.append(_pad2d(lyr["b2"], 1, C))
    w1s = jnp.stack(w1s)                        # (L, C, C)
    b1s = jnp.stack(b1s)                        # (L, 1, C)
    w2s = jnp.stack(w2s)                        # (L, C, C)
    b2s = jnp.stack(b2s)                        # (L, 1, C)

    x_pad = _pad2d(x.astype(jnp.float32), N, C)

    num_convs = num_steps - 1
    flops = num_convs * (2 * N * N * C + 4 * N * C * C) + 4 * N * C * C
    bytes_accessed = (2 * N * N + 4 * N * C                      # adjacency (bf16) + x0
                      + num_steps * (8 * C * C + 8 * C)          # weight + bias stacks
                      + 4 * N * C)                               # padded output

    out = pl.pallas_call(
        gin_fused_kernel,
        out_shape=jax.ShapeDtypeStruct((N, C), jnp.float32),
        grid_spec=pltpu.PrefetchScalarGridSpec(
            num_scalar_prefetch=0,
            grid=(num_steps,),
            in_specs=[
                pl.BlockSpec((N, N), lambda l: (0, 0)),          # adjacency: DMA'd once
                pl.BlockSpec((N, C), lambda l: (0, 0)),          # input features: DMA'd once
                pl.BlockSpec((1, C, C), lambda l: (l, 0, 0)),    # W1 (BN folded), per layer
                pl.BlockSpec((1, 1, C), lambda l: (l, 0, 0)),    # b1 (BN folded), per layer
                pl.BlockSpec((1, C, C), lambda l: (l, 0, 0)),    # W2, per layer
                pl.BlockSpec((1, 1, C), lambda l: (l, 0, 0)),    # b2, per layer
            ],
            out_specs=pl.BlockSpec((N, C), lambda l: (0, 0)),    # written on last layer only
            scratch_shapes=[pltpu.VMEM((N, C), jnp.float32)],    # resident node features
        ),
        compiler_params=pltpu.CompilerParams(
            # layer axis is a sequential dependence (x_{l+1} needs x_l) -> arbitrary.
            dimension_semantics=("arbitrary",),
        ),
        cost_estimate=pl.CostEstimate(flops=flops, transcendentals=0,
                                      bytes_accessed=bytes_accessed),
    )(adj, x_pad, w1s, b1s, w2s, b2s)

    return out[:, :out_channels]


# ------------------------------ reference (JAX) ------------------------------ #

def gin_forward_ref(params, x, edge_index, num_nodes):
    src, dst = edge_index[0], edge_index[1]
    adj = jnp.zeros((num_nodes, num_nodes), jnp.float32)
    adj = adj.at[dst, src].add(1.0)
    for layer in params["convs"]:
        scale, shift = fold_batchnorm(layer["gamma"], layer["beta"],
                                      layer["mean"], layer["var"])
        z = adj @ x + x
        h = jnp.maximum((z @ layer["w1"] + layer["b1"]) * scale + shift, 0.0)
        x = jnp.maximum(h @ layer["w2"] + layer["b2"], 0.0)
    mlp = params["mlp"]
    scale, shift = fold_batchnorm(mlp["gamma"], mlp["beta"], mlp["mean"], mlp["var"])
    h = jnp.maximum((x @ mlp["w1"] + mlp["b1"]) * scale + shift, 0.0)
    return h @ mlp["w2"] + mlp["b2"]


# ----------------------------------- main ------------------------------------ #

if __name__ == "__main__":
    IN_CHANNELS, HIDDEN, OUT_CHANNELS, NUM_LAYERS = 16, 32, 8, 2
    NUM_NODES, NUM_EDGES = 32, 64

    key = jax.random.PRNGKey(0)
    key, kx, ke = jax.random.split(key, 3)

    x = jax.random.normal(kx, (NUM_NODES, IN_CHANNELS), jnp.float32)
    edge_index = jax.random.randint(ke, (2, NUM_EDGES), 0, NUM_NODES, jnp.int32)

    params = init_gin_params(key, IN_CHANNELS, HIDDEN, OUT_CHANNELS, NUM_LAYERS)

    out = gin_forward(params, x, edge_index, num_nodes=NUM_NODES,
                      out_channels=OUT_CHANNELS)
    out = jax.block_until_ready(out)

    ref = gin_forward_ref(params, x, edge_index, NUM_NODES)
    assert out.shape == (NUM_NODES, OUT_CHANNELS), out.shape
    assert jnp.allclose(out, ref, atol=1e-4, rtol=1e-4), "mismatch vs JAX reference"

    print("KERNEL_OK")
</pallas_src>

<mosaic_0001>
module attributes {stable_mosaic.version = 11 : i64} {
  func.func private @main(%arg0: i32) attributes {dimension_semantics = [#tpu.dimension_semantics<core_parallel>], iteration_bounds = array<i64: 2>, tpu.core_type = #tpu.core_type<sc_scalar_subcore>, window_params = []} {
    return
  }
}

module attributes {stable_mosaic.version = 11 : i64} {
  func.func private @main(%arg0: i32) attributes {dimension_semantics = [#tpu.dimension_semantics<core_parallel>], iteration_bounds = array<i64: 2>, tpu.core_type = #tpu.core_type<sc_scalar_subcore>, window_params = []} {
    return
  }
}

module attributes {stable_mosaic.version = 11 : i64} {
  func.func @gin_fused_kernel(%arg0: i32, %arg1: memref<32x32xbf16, #tpu.memory_space<vmem>>, %arg2: memref<32x128xf32, #tpu.memory_space<vmem>>, %arg3: memref<1x128x128xf32, #tpu.memory_space<vmem>>, %arg4: memref<1x1x128xf32, #tpu.memory_space<vmem>>, %arg5: memref<1x128x128xf32, #tpu.memory_space<vmem>>, %arg6: memref<1x1x128xf32, #tpu.memory_space<vmem>>, %arg7: memref<32x128xf32, #tpu.memory_space<vmem>>, %arg8: memref<32x128xf32, #tpu.memory_space<vmem>>) attributes {dimension_semantics = [#tpu.dimension_semantics<arbitrary>], iteration_bounds = array<i64: 3>, scalar_prefetch = 0 : i64, scratch_operands = 1 : i64, tpu.core_type = #tpu.core_type<tc>, window_params = [{pipeline_mode = #tpu.pipeline_mode<synchronous>, transform_indices = @transform_0, window_bounds = array<i64: 32, 32>}, {pipeline_mode = #tpu.pipeline_mode<synchronous>, transform_indices = @transform_1, window_bounds = array<i64: 32, 128>}, {transform_indices = @transform_2, window_bounds = array<i64: 1, 128, 128>}, {transform_indices = @transform_3, window_bounds = array<i64: 1, 1, 128>}, {transform_indices = @transform_4, window_bounds = array<i64: 1, 128, 128>}, {transform_indices = @transform_5, window_bounds = array<i64: 1, 1, 128>}, {pipeline_mode = #tpu.pipeline_mode<synchronous>, transform_indices = @transform_6, window_bounds = array<i64: 32, 128>}]} {
    %c0_i32 = arith.constant 0 : i32
    %0 = arith.cmpi eq, %arg0, %c0_i32 : i32
    %1 = arith.extui %0 : i1 to i32
    %c0_i32_0 = arith.constant 0 : i32
    %2 = arith.cmpi ne, %1, %c0_i32_0 : i32
    scf.if %2 {
      %c0 = arith.constant 0 : index
      %c0_4 = arith.constant 0 : index
      %9 = vector.load %arg2[%c0, %c0_4] : memref<32x128xf32, #tpu.memory_space<vmem>>, vector<32x128xf32>
      %c0_5 = arith.constant 0 : index
      %c0_6 = arith.constant 0 : index
      %10 = vector.load %arg8[%c0_5, %c0_6] : memref<32x128xf32, #tpu.memory_space<vmem>>, vector<32x128xf32>
      tpu.vector_store %arg8[%c0_5, %c0_6], %9 {strides = array<i32>} : memref<32x128xf32, #tpu.memory_space<vmem>>, vector<32x128xf32>,
    } else {
    }
    %c2_i32 = arith.constant 2 : i32
    %3 = arith.cmpi slt, %arg0, %c2_i32 : i32
    %4 = arith.extui %3 : i1 to i32
    %c0_i32_1 = arith.constant 0 : i32
    %5 = arith.cmpi ne, %4, %c0_i32_1 : i32
    scf.if %5 {
      %c0 = arith.constant 0 : index
      %c0_4 = arith.constant 0 : index
      %9 = vector.load %arg8[%c0, %c0_4] : memref<32x128xf32, #tpu.memory_space<vmem>>, vector<32x128xf32>
      %c0_5 = arith.constant 0 : index
      %c0_6 = arith.constant 0 : index
      %10 = vector.load %arg1[%c0_5, %c0_6] : memref<32x32xbf16, #tpu.memory_space<vmem>>, vector<32x32xbf16>
      %11 = arith.extf %10 : vector<32x32xbf16> to vector<32x32xf32>
      %cst = arith.constant dense<0.000000e+00> : vector<32x128xf32>
      %12 = tpu.matmul %11, %9, %cst {dimension_numbers = #tpu.dot_dimension_numbers<[1], [0], [0], [1], [0, 0, 1, 1], [], []>} : vector<32x32xf32>, vector<32x128xf32>, vector<32x128xf32> -> vector<32x128xf32>
      %c0_7 = arith.constant 0 : index
      %c0_8 = arith.constant 0 : index
      %c0_9 = arith.constant 0 : index
      %13 = vector.load %arg3[%c0_7, %c0_8, %c0_9] : memref<1x128x128xf32, #tpu.memory_space<vmem>>, vector<1x128x128xf32>
      %14 = vector.shape_cast %13 : vector<1x128x128xf32> to vector<128x128xf32>
      %cst_10 = arith.constant dense<0.000000e+00> : vector<32x128xf32>
      %15 = tpu.matmul %12, %14, %cst_10 {dimension_numbers = #tpu.dot_dimension_numbers<[1], [0], [0], [1], [0, 0, 1, 1], [], []>} : vector<32x128xf32>, vector<128x128xf32>, vector<32x128xf32> -> vector<32x128xf32>
      %c0_11 = arith.constant 0 : index
      %c0_12 = arith.constant 0 : index
      %c0_13 = arith.constant 0 : index
      %16 = vector.load %arg4[%c0_11, %c0_12, %c0_13] : memref<1x1x128xf32, #tpu.memory_space<vmem>>, vector<1x1x128xf32>
      %17 = vector.shape_cast %16 : vector<1x1x128xf32> to vector<1x128xf32>
      %18 = vector.broadcast %17 : vector<1x128xf32> to vector<32x128xf32>
      %19 = arith.addf %15, %18 : vector<32x128xf32>
      %cst_14 = arith.constant 0.000000e+00 : f32
      %20 = vector.broadcast %cst_14 : f32 to vector<32x128xf32>
      %21 = arith.maximumf %19, %20 : vector<32x128xf32>
      %c0_15 = arith.constant 0 : index
      %c0_16 = arith.constant 0 : index
      %c0_17 = arith.constant 0 : index
      %22 = vector.load %arg5[%c0_15, %c0_16, %c0_17] : memref<1x128x128xf32, #tpu.memory_space<vmem>>, vector<1x128x128xf32>
      %23 = vector.shape_cast %22 : vector<1x128x128xf32> to vector<128x128xf32>
      %cst_18 = arith.constant dense<0.000000e+00> : vector<32x128xf32>
      %24 = tpu.matmul %21, %23, %cst_18 {dimension_numbers = #tpu.dot_dimension_numbers<[1], [0], [0], [1], [0, 0, 1, 1], [], []>} : vector<32x128xf32>, vector<128x128xf32>, vector<32x128xf32> -> vector<32x128xf32>
      %c0_19 = arith.constant 0 : index
      %c0_20 = arith.constant 0 : index
      %c0_21 = arith.constant 0 : index
      %25 = vector.load %arg6[%c0_19, %c0_20, %c0_21] : memref<1x1x128xf32, #tpu.memory_space<vmem>>, vector<1x1x128xf32>
      %26 = vector.shape_cast %25 : vector<1x1x128xf32> to vector<1x128xf32>
      %27 = vector.broadcast %26 : vector<1x128xf32> to vector<32x128xf32>
      %28 = arith.addf %24, %27 : vector<32x128xf32>
      %cst_22 = arith.constant 0.000000e+00 : f32
      %29 = vector.broadcast %cst_22 : f32 to vector<32x128xf32>
      %30 = arith.maximumf %28, %29 : vector<32x128xf32>
      %c0_23 = arith.constant 0 : index
      %c0_24 = arith.constant 0 : index
      %31 = vector.load %arg8[%c0_23, %c0_24] : memref<32x128xf32, #tpu.memory_space<vmem>>, vector<32x128xf32>
      tpu.vector_store %arg8[%c0_23, %c0_24], %30 {strides = array<i32>} : memref<32x128xf32, #tpu.memory_space<vmem>>, vector<32x128xf32>,
    } else {
    }
    %c2_i32_2 = arith.constant 2 : i32
    %6 = arith.cmpi eq, %arg0, %c2_i32_2 : i32
    %7 = arith.extui %6 : i1 to i32
    %c0_i32_3 = arith.constant 0 : i32
    %8 = arith.cmpi ne, %7, %c0_i32_3 : i32
    scf.if %8 {
      %c0 = arith.constant 0 : index
      %c0_4 = arith.constant 0 : index
      %9 = vector.load %arg8[%c0, %c0_4] : memref<32x128xf32, #tpu.memory_space<vmem>>, vector<32x128xf32>
      %c0_5 = arith.constant 0 : index
      %c0_6 = arith.constant 0 : index
      %c0_7 = arith.constant 0 : index
      %10 = vector.load %arg3[%c0_5, %c0_6, %c0_7] : memref<1x128x128xf32, #tpu.memory_space<vmem>>, vector<1x128x128xf32>
      %11 = vector.shape_cast %10 : vector<1x128x128xf32> to vector<128x128xf32>
      %cst = arith.constant dense<0.000000e+00> : vector<32x128xf32>
      %12 = tpu.matmul %9, %11, %cst {dimension_numbers = #tpu.dot_dimension_numbers<[1], [0], [0], [1], [0, 0, 1, 1], [], []>} : vector<32x128xf32>, vector<128x128xf32>, vector<32x128xf32> -> vector<32x128xf32>
      %c0_8 = arith.constant 0 : index
      %c0_9 = arith.constant 0 : index
      %c0_10 = arith.constant 0 : index
      %13 = vector.load %arg4[%c0_8, %c0_9, %c0_10] : memref<1x1x128xf32, #tpu.memory_space<vmem>>, vector<1x1x128xf32>
      %14 = vector.shape_cast %13 : vector<1x1x128xf32> to vector<1x128xf32>
      %15 = vector.broadcast %14 : vector<1x128xf32> to vector<32x128xf32>
      %16 = arith.addf %12, %15 : vector<32x128xf32>
      %cst_11 = arith.constant 0.000000e+00 : f32
      %17 = vector.broadcast %cst_11 : f32 to vector<32x128xf32>
      %18 = arith.maximumf %16, %17 : vector<32x128xf32>
      %c0_12 = arith.constant 0 : index
      %c0_13 = arith.constant 0 : index
      %c0_14 = arith.constant 0 : index
      %19 = vector.load %arg5[%c0_12, %c0_13, %c0_14] : memref<1x128x128xf32, #tpu.memory_space<vmem>>, vector<1x128x128xf32>
      %20 = vector.shape_cast %19 : vector<1x128x128xf32> to vector<128x128xf32>
      %cst_15 = arith.constant dense<0.000000e+00> : vector<32x128xf32>
      %21 = tpu.matmul %18, %20, %cst_15 {dimension_numbers = #tpu.dot_dimension_numbers<[1], [0], [0], [1], [0, 0, 1, 1], [], []>} : vector<32x128xf32>, vector<128x128xf32>, vector<32x128xf32> -> vector<32x128xf32>
      %c0_16 = arith.constant 0 : index
      %c0_17 = arith.constant 0 : index
      %c0_18 = arith.constant 0 : index
      %22 = vector.load %arg6[%c0_16, %c0_17, %c0_18] : memref<1x1x128xf32, #tpu.memory_space<vmem>>, vector<1x1x128xf32>
      %23 = vector.shape_cast %22 : vector<1x1x128xf32> to vector<1x128xf32>
      %24 = vector.broadcast %23 : vector<1x128xf32> to vector<32x128xf32>
      %25 = arith.addf %21, %24 : vector<32x128xf32>
      %c0_19 = arith.constant 0 : index
      %c0_20 = arith.constant 0 : index
      %26 = vector.load %arg7[%c0_19, %c0_20] : memref<32x128xf32, #tpu.memory_space<vmem>>, vector<32x128xf32>
      tpu.vector_store %arg7[%c0_19, %c0_20], %25 {strides = array<i32>} : memref<32x128xf32, #tpu.memory_space<vmem>>, vector<32x128xf32>,
    } else {
    }
    return
  }
  func.func @transform_0(%arg0: i32) -> (i32, i32) {
    %c0_i32 = arith.constant 0 : i32
    %c0_i32_0 = arith.constant 0 : i32
    %c0_i32_1 = arith.constant 0 : i32
    return %c0_i32, %c0_i32_0 : i32, i32
  }
  func.func @transform_1(%arg0: i32) -> (i32, i32) {
    %c0_i32 = arith.constant 0 : i32
    %c0_i32_0 = arith.constant 0 : i32
    %c0_i32_1 = arith.constant 0 : i32
    return %c0_i32, %c0_i32_0 : i32, i32
  }
  func.func @transform_2(%arg0: i32) -> (i32, i32, i32) {
    %c0_i32 = arith.constant 0 : i32
    %c0_i32_0 = arith.constant 0 : i32
    %c0_i32_1 = arith.constant 0 : i32
    return %arg0, %c0_i32, %c0_i32_0 : i32, i32, i32
  }
  func.func @transform_3(%arg0: i32) -> (i32, i32, i32) {
    %c0_i32 = arith.constant 0 : i32
    %c0_i32_0 = arith.constant 0 : i32
    %c0_i32_1 = arith.constant 0 : i32
    return %arg0, %c0_i32, %c0_i32_0 : i32, i32, i32
  }
  func.func @transform_4(%arg0: i32) -> (i32, i32, i32) {
    %c0_i32 = arith.constant 0 : i32
    %c0_i32_0 = arith.constant 0 : i32
    %c0_i32_1 = arith.constant 0 : i32
    return %arg0, %c0_i32, %c0_i32_0 : i32, i32, i32
  }
  func.func @transform_5(%arg0: i32) -> (i32, i32, i32) {
    %c0_i32 = arith.constant 0 : i32
    %c0_i32_0 = arith.constant 0 : i32
    %c0_i32_1 = arith.constant 0 : i32
    return %arg0, %c0_i32, %c0_i32_0 : i32, i32, i32
  }
  func.func @transform_6(%arg0: i32) -> (i32, i32) {
    %c0_i32 = arith.constant 0 : i32
    %c0_i32_0 = arith.constant 0 : i32
    %c0_i32_1 = arith.constant 0 : i32
    return %c0_i32, %c0_i32_0 : i32, i32
  }
}

</mosaic_0001>

<bundles_post_ra>
// kernel: gin_forward.1
= control target key start
LH: loop header
LB: loop body
LE: loop exit
PB: predicated region body
PF: predicated region fallthrough
CT: control target
= control target key end

     0   :  { %s1402_s21 = smov 0   ;;  %s1542_s0 = inlined_call_operand.vmem [shape: bf16[32,32], index: 0, kind: input, shape index: {}]   ;;  %s1543_s1 = inlined_call_operand.vmem [shape: f32[32,128], index: 1, kind: input, shape index: {}]   ;;  %s1544_s2 = inlined_call_operand.vmem [shape: f32[3,128,128], index: 2, kind: input, shape index: {}]   ;;  %s1545_s3 = inlined_call_operand.vmem [shape: f32[3,1,128], index: 3, kind: input, shape index: {}]   ;;  %s1546_s4 = inlined_call_operand.vmem [shape: f32[3,128,128], index: 4, kind: input, shape index: {}]   ;;  %s1547_s5 = inlined_call_operand.vmem [shape: f32[3,1,128], index: 5, kind: input, shape index: {}]   ;;  %s1548_s6 = inlined_call_operand.vmem [shape: f32[32,128], index: 6, kind: output, shape index: {}]  }
   0x1 LB: > { %s1408_s22 = sadd.s32 4294967295, %s1365_s21   ;;  %p932_p0 = scmp.ge.s32.totalorder %s1365_s21, 1  ;;  %s1365_s21 = sphi %s1402_s21, %s16_s21  }
   0x2   : > { %p233_p1 = scmp.lt.s32.totalorder %s1365_s21, 4 }
   0x4   : > { %p234_p2 = pnand %p932_p0, %p233_p1 }
   0x5   : > { %p269_p3 = scmp.lt.s32.totalorder (!%p234_p2), %s1408_s22, 2  ;;  %p937_p4 = scmp.ne.s32.totalorder (!%p234_p2), %s1408_s22, 0 }
   0x6   : > { %237 = sbr.rel (%p234_p2) target bundleno = 1161 (0x489), region = 44 }
   0xd   : > { %s270_s23 = scalar_select %p269_p3, %s1408_s22, 2 }
   0xe   : > { %288 = sbr.rel (%p937_p4) target bundleno = 21 (0x15), region = 48  ;;  %v289_v0 = vld [vmem:[%s1543_s1] sm:$0xff] (!%p937_p4)  ;;  %v290_v1 = vld [vmem:[%s1543_s1 + $0x8] sm:$0xff] (!%p937_p4)  ;;  %v291_v2 = vld [vmem:[%s1543_s1 + $0x10] sm:$0xff] (!%p937_p4) }
   0xf   : > { %s950_s24 = sshll.u32 %s270_s23, 7  ;;  %s1417_s27 = scalar_lea.vmem %s1545_s3, %s270_s23  ;;  %293 = vst [vmem:[#allocation2] sm:$0xff] (!%p937_p4), %v289_v0  ;;  %294 = vst [vmem:[#allocation2 + $0x8] sm:$0xff] (!%p937_p4), %v290_v1  ;;  %v292_v3 = vld [vmem:[%s1543_s1 + $0x18] sm:$0xff] (!%p937_p4) }
  0x10   : > { %s1422_s30 = scalar_lea.vmem %s1544_s2, %s950_s24  ;;  %s1427_s9 = scalar_lea.vmem %s1546_s4, %s950_s24  ;;  %295 = vst [vmem:[#allocation2 + $0x10] sm:$0xff] (!%p937_p4), %v291_v2  ;;  %296 = vst [vmem:[#allocation2 + $0x18] sm:$0xff] (!%p937_p4), %v292_v3 }
  0x11   : > { %s1432_s12 = scalar_lea.vmem %s1547_s5, %s270_s23 }
  0x15 PF: > { %p938_p5 = scmp.ge.s32.totalorder %s1408_s22, 2 }
  0x16   : > { %v301_v4 = vld [vmem:[#allocation2] sm:$0xff] (!%p938_p5)  ;;  %v302_v5 = vld [vmem:[#allocation2 + $0x8] sm:$0xff] (!%p938_p5)  ;;  %vm313_vm0 = vcmask (!%p938_p5), 261120   ;;  %v413_v14 = vld [vmem:[%s1422_s30 + $0x10] sm:$0xff] (!%p938_p5) }
  0x17   : > { %300 = sbr.rel (%p938_p5) target bundleno = 687 (0x2af), region = 52  ;;  %v303_v6 = vld [vmem:[#allocation2 + $0x10] sm:$0xff] (!%p938_p5)  ;;  %v1215_v7 = vpack.c.bf16 (!%p938_p5), %v302_v5, %v301_v4  ;;  %v304_v8 = vld [vmem:[#allocation2 + $0x18] sm:$0xff] (!%p938_p5)  ;;  %v953_v9 = vld [vmem:[%s1542_s0] sm:$0xff] (!%p938_p5)  }
  0x18   : > { %v1219_v10 = vpack.c.bf16 (!%p938_p5), %v304_v8, %v303_v6  ;;  %v954_v11 = vunpack.c.l.bf16 (!%p938_p5), %v953_v9  ;;  %v411_v12 = vld [vmem:[%s1422_s30] sm:$0xff] (!%p938_p5)  ;;  %v412_v13 = vld [vmem:[%s1422_s30 + $0x8] sm:$0xff] (!%p938_p5)  ;;  %v414_v16 = vld [vmem:[%s1422_s30 + $0x18] sm:$0xff] (!%p938_p5)  ;;  %v955_v21 = vunpack.c.h.bf16 (!%p938_p5), %v953_v9 }
  0x19   : > { %1216 = vmatprep.subr.bf16.mxu0 (!%p938_p5), %v1215_v7  ;;  %v1223_v15 = vpack.c.bf16 (!%p938_p5), %v412_v13, %v411_v12  ;;  %v1227_v17 = vpack.c.bf16 (!%p938_p5), %v414_v16, %v413_v14  ;;  %v415_v18 = vld [vmem:[%s1422_s30 + $0x20] sm:$0xff] (!%p938_p5)  ;;  %v416_v19 = vld [vmem:[%s1422_s30 + $0x28] sm:$0xff] (!%p938_p5)  ;;  %v417_v24 = vld [vmem:[%s1422_s30 + $0x30] sm:$0xff] (!%p938_p5) }
  0x1a   : > { %1218 = vmatpush3.bf16.msra.mxu0 (!%p938_p5), %v1215_v7  ;;  %1057 = vmatprep.mubr.msk.f32.mxu0 (!%p938_p5), %vm313_vm0, %v954_v11  ;;  %v960_v20 = vld [vmem:[%s1542_s0 + $0x8] sm:$0xff] (!%p938_p5)   ;;  %v1231_v22 = vpack.c.bf16 (!%p938_p5), %v416_v19, %v415_v18  ;;  %v418_v25 = vld [vmem:[%s1422_s30 + $0x38] sm:$0xff] (!%p938_p5)  ;;  %v419_v28 = vld [vmem:[%s1422_s30 + $0x40] sm:$0xff] (!%p938_p5) }
  0x1b   : > { %1220 = vmatprep.subr.bf16.mxu0 (!%p938_p5), %v1219_v10  ;;  %1224 = vmatprep.subr.bf16.mxu1 (!%p938_p5), %v1223_v15  ;;  %v958_v23 = vunpack.c.l.bf16 (!%p938_p5), %v960_v20  ;;  %v959_v26 = vunpack.c.h.bf16 (!%p938_p5), %v960_v20  ;;  %v1235_v27 = vpack.c.bf16 (!%p938_p5), %v418_v25, %v417_v24  ;;  %v420_v29 = vld [vmem:[%s1422_s30 + $0x48] sm:$0xff] (!%p938_p5)  ;;  %v421_v31 = vld [vmem:[%s1422_s30 + $0x50] sm:$0xff] (!%p938_p5)  ;;  %v422_v32 = vld [vmem:[%s1422_s30 + $0x58] sm:$0xff] (!%p938_p5) }
  0x1c   : > { %1226 = vmatpush3.bf16.msra.mxu1 (!%p938_p5), %v1223_v15  ;;  %v1239_v30 = vpack.c.bf16 (!%p938_p5), %v420_v29, %v419_v28  ;;  %v1243_v33 = vpack.c.bf16 (!%p938_p5), %v422_v32, %v421_v31  ;;  %v423_v34 = vld [vmem:[%s1422_s30 + $0x60] sm:$0xff] (!%p938_p5)  ;;  %v424_v35 = vld [vmem:[%s1422_s30 + $0x68] sm:$0xff] (!%p938_p5)  ;;  %v425_v37 = vld [vmem:[%s1422_s30 + $0x70] sm:$0xff] (!%p938_p5) }
  0x1d   : > { %1228 = vmatprep.subr.bf16.mxu1 (!%p938_p5), %v1227_v17  ;;  %v1247_v36 = vpack.c.bf16 (!%p938_p5), %v424_v35, %v423_v34  ;;  %v426_v38 = vld [vmem:[%s1422_s30 + $0x78] sm:$0xff] (!%p938_p5)  ;;  %v523_v40 = vld [vmem:[%s1427_s9] sm:$0xff] (!%p938_p5)  ;;  %v524_v41 = vld [vmem:[%s1427_s9 + $0x8] sm:$0xff] (!%p938_p5) }
  0x1e   : > { %1222 = vmatpush3.bf16.msra.mxu0 %v1219_v10  ;;  %v1251_v39 = vpack.c.bf16 %v426_v38, %v425_v37  ;;  %v525_v42 = vld [vmem:[%s1427_s9 + $0x10] sm:$0xff]  ;;  %v1255_v43 = vpack.c.bf16 %v524_v41, %v523_v40  ;;  %v526_v44 = vld [vmem:[%s1427_s9 + $0x18] sm:$0xff]  ;;  %v527_v46 = vld [vmem:[%s1427_s9 + $0x20] sm:$0xff] }
  0x1f   : > { %v1259_v45 = vpack.c.bf16 %v526_v44, %v525_v42  ;;  %v528_v47 = vld [vmem:[%s1427_s9 + $0x28] sm:$0xff]  ;;  %v529_v49 = vld [vmem:[%s1427_s9 + $0x30] sm:$0xff]  ;;  %v530_v50 = vld [vmem:[%s1427_s9 + $0x38] sm:$0xff] }
  0x20   : > { %1230 = vmatpush3.bf16.msra.mxu1 %v1227_v17  ;;  %1256 = vmatprep.subr.bf16.mxu0 %v1255_v43  ;;  %v1263_v48 = vpack.c.bf16 %v528_v47, %v527_v46  ;;  %v1267_v51 = vpack.c.bf16 %v530_v50, %v529_v49  ;;  %v531_v52 = vld [vmem:[%s1427_s9 + $0x40] sm:$0xff]  ;;  %v532_v53 = vld [vmem:[%s1427_s9 + $0x48] sm:$0xff]  ;;  %v533_v55 = vld [vmem:[%s1427_s9 + $0x50] sm:$0xff] }
  0x21   : > { %1058 = vmatmul.mubr.msk.f32.vlgmr.msra.gmra.mrb[0].mxu0 %vm313_vm0, %v955_v21  ;;  %1232 = vmatprep.subr.bf16.mxu1 %v1231_v22  ;;  %v1271_v54 = vpack.c.bf16 %v532_v53, %v531_v52  ;;  %v534_v56 = vld [vmem:[%s1427_s9 + $0x58] sm:$0xff]  ;;  %v535_v58 = vld [vmem:[%s1427_s9 + $0x60] sm:$0xff]  ;;  %v536_v59 = vld [vmem:[%s1427_s9 + $0x68] sm:$0xff] }
  0x22   : > { %1060 = vmatprep.mubr.msk.f32.mxu0 %vm313_vm0, %v958_v23  ;;  %1258 = vmatpush3.bf16.msra.mxu0 %v1255_v43  ;;  %v1275_v57 = vpack.c.bf16 %v534_v56, %v533_v55  ;;  %v1279_v60 = vpack.c.bf16 %v536_v59, %v535_v58  ;;  %v537_v1 = vld [vmem:[%s1427_s9 + $0x70] sm:$0xff]  ;;  %v538_v2 = vld [vmem:[%s1427_s9 + $0x78] sm:$0xff]  ;;  %v943_v4 = vld [vmem:[%s1417_s27] ss:$0 sm:$0xff] }
  0x23   : > { %1260 = vmatprep.subr.bf16.mxu0 %v1259_v45  ;;  %v1283_v3 = vpack.c.bf16 %v538_v2, %v537_v1  ;;  %v944_v17 = vld [vmem:[%s1432_s12] ss:$0 sm:$0xff] }
  0x24   : > { %1234 = vmatpush3.bf16.msra.mxu1 %v1231_v22 }
  0x25   : > { %1061 = vmatmul.mubr.msk.f32.gmra.mrb[2].mxu0 %vm313_vm0, %v959_v26  ;;  %1236 = vmatprep.subr.bf16.mxu1 %v1235_v27 }
  0x26   : > { %1262 = vmatpush3.bf16.msra.mxu0 %v1259_v45 }
  0x27   : > { %1264 = vmatprep.subr.bf16.mxu0 %v1263_v48 }
  0x28   : > { %1238 = vmatpush3.bf16.msra.mxu1 %v1235_v27 }
  0x29   : > { %1240 = vmatprep.subr.bf16.mxu1 %v1239_v30 }
  0x2a   : > { %1266 = vmatpush3.bf16.msra.mxu0 %v1263_v48 }
  0x2b   : > { %1268 = vmatprep.subr.bf16.mxu0 %v1267_v51 }
  0x2c   : > { %1242 = vmatpush3.bf16.msra.mxu1 %v1239_v30 }
  0x2d   : > { %1244 = vmatprep.subr.bf16.mxu1 %v1243_v33 }
  0x2e   : > { %1270 = vmatpush3.bf16.msra.mxu0 %v1267_v51 }
  0x2f   : > { %1272 = vmatprep.subr.bf16.mxu0 %v1271_v54 }
  0x30   : > { %1246 = vmatpush3.bf16.msra.mxu1 %v1243_v33 }
  0x31   : > { %1248 = vmatprep.subr.bf16.mxu1 %v1247_v36 }
  0x32   : > { %1274 = vmatpush3.bf16.msra.mxu0 %v1271_v54 }
  0x33   : > { %1276 = vmatprep.subr.bf16.mxu0 %v1275_v57 }
  0x34   : > { %1250 = vmatpush3.bf16.msra.mxu1 %v1247_v36 }
  0x35   : > { %1252 = vmatprep.subr.bf16.mxu1 %v1251_v39 }
  0x36   : > { %1278 = vmatpush3.bf16.msra.mxu0 %v1275_v57 }
  0x37   : > { %1280 = vmatprep.subr.bf16.mxu0 %v1279_v60 }
  0x38   : > { %1254 = vmatpush3.bf16.msra.mxu1 %v1251_v39 }
  0x3a   : > { %1282 = vmatpush3.bf16.msra.mxu0 %v1279_v60 }
  0x3b   : > { %1284 = vmatprep.subr.bf16.mxu0 %v1283_v3 }
  0x3e   : > { %1286 = vmatpush3.bf16.msra.mxu0 %v1283_v3 }
  0xf4   : > { %v1059_v61 = vpop.f32.mrb[0].mxu0 }
  0xf5   : > { %v392_v62 = vpop.f32.mrb[1].mxu0 }
  0xf6   : > { %1095 = vmatprep.mubr.f32.mxu1 %v392_v62 }
  0xf7   : > { %1096 = vmatmul.mubr.f32.vlgmr.msra.gmra.mrb[0].mxu1 %v1059_v61 }
  0xf8   : > { %v1062_v63 = vpop.f32.mrb[2].mxu0 }
  0xf9   : > { %v402_v0 = vpop.f32.mrb[3].mxu0 }
  0xfa   : > { %1098 = vmatprep.mubr.f32.mxu1 %v402_v0 }
  0xfb   : > { %1099 = vmatmul.mubr.f32.gmra.mrb[2].mxu1 %v1062_v63 }
 0x1ca   : > { %v1097_v5 = vpop.f32.mrb[0].mxu1 }
 0x1cb   : > { %v506_v6 = vadd.f32 %v1097_v5, %v943_v4  ;;  %v500_v7 = vpop.f32.mrb[1].mxu1 }
 0x1cc   : > { %v501_v8 = vadd.f32 %v943_v4, %v500_v7 }
 0x1cd   : > { %v520_v11 = vmax.f32 %v506_v6, 0.0 }
 0x1ce   : > { %v519_v9 = vmax.f32 %v501_v8, 0.0  ;;  %v1100_v10 = vpop.f32.mrb[2].mxu1 }
 0x1cf   : > { %v516_v12 = vadd.f32 %v1100_v10, %v943_v4  ;;  %v510_v13 = vpop.f32.mrb[3].mxu1 }
 0x1d0   : > { %v511_v14 = vadd.f32 %v943_v4, %v510_v13  ;;  %1133 = vmatprep.mubr.f32.mxu0 %v519_v9 }
 0x1d1   : > { %1134 = vmatmul.mubr.f32.vlgmr.msra.gmra.mrb[4].mxu0 %v520_v11  ;;  %v522_v16 = vmax.f32 %v516_v12, 0.0 }
 0x1d2   : > { %v521_v15 = vmax.f32 %v511_v14, 0.0 }
 0x1d4   : > { %1136 = vmatprep.mubr.f32.mxu0 %v521_v15 }
 0x1d5   : > { %1137 = vmatmul.mubr.f32.gmra.mrb[6].mxu0 %v522_v16 }
 0x2a4   : > { %v1135_v18 = vpop.f32.mrb[4].mxu0 }
 0x2a5   : > { %v618_v19 = vadd.f32 %v1135_v18, %v944_v17  ;;  %v612_v20 = vpop.f32.mrb[5].mxu0 }
 0x2a6   : > { %v613_v21 = vadd.f32 %v944_v17, %v612_v20 }
 0x2a7   : > { %v632_v22 = vmax.f32 %v618_v19, 0.0 }
 0x2a8   : > { %v631_v23 = vmax.f32 %v613_v21, 0.0  ;;  %v1138_v24 = vpop.f32.mrb[6].mxu0 }
 0x2a9   : > { %636 = vst [vmem:[#allocation2 + $0x8] sm:$0xff] %v632_v22  ;;  %v628_v25 = vadd.f32 %v1138_v24, %v944_v17  ;;  %v622_v26 = vpop.f32.mrb[7].mxu0 }
 0x2aa   : > { %635 = vst [vmem:[#allocation2] sm:$0xff] %v631_v23  ;;  %v623_v27 = vadd.f32 %v944_v17, %v622_v26 }
 0x2ab   : > { %v634_v28 = vmax.f32 %v628_v25, 0.0 }
 0x2ac   : > { %v633_v29 = vmax.f32 %v623_v27, 0.0 }
 0x2ad   : > { %638 = vst [vmem:[#allocation2 + $0x18] sm:$0xff] %v634_v28 }
 0x2ae   : > { %637 = vst [vmem:[#allocation2 + $0x10] sm:$0xff] %v633_v29 }
 0x2af PF: > { %p945_p6 = scmp.ne.s32.totalorder %s1408_s22, 2 }
 0x2b0   : > { %v647_v30 = vld [vmem:[%s1422_s30] sm:$0xff] (!%p945_p6)  ;;  %v648_v31 = vld [vmem:[%s1422_s30 + $0x8] sm:$0xff] (!%p945_p6)  ;;  %v649_v32 = vld [vmem:[%s1422_s30 + $0x10] sm:$0xff] (!%p945_p6) }
 0x2b1   : > { %642 = sbr.rel (%p945_p6) target bundleno = 1161 (0x489), region = 56  ;;  %v1287_v33 = vpack.c.bf16 (!%p945_p6), %v648_v31, %v647_v30  ;;  %v650_v34 = vld [vmem:[%s1422_s30 + $0x18] sm:$0xff] (!%p945_p6)  ;;  %v651_v36 = vld [vmem:[%s1422_s30 + $0x20] sm:$0xff] (!%p945_p6)  ;;  %v652_v37 = vld [vmem:[%s1422_s30 + $0x28] sm:$0xff] (!%p945_p6) }
 0x2b2   : > { %v1291_v35 = vpack.c.bf16 (!%p945_p6), %v650_v34, %v649_v32  ;;  %v1295_v38 = vpack.c.bf16 (!%p945_p6), %v652_v37, %v651_v36  ;;  %v643_v39 = vld [vmem:[#allocation2] sm:$0xff] (!%p945_p6)  ;;  %v653_v40 = vld [vmem:[%s1422_s30 + $0x30] sm:$0xff] (!%p945_p6)  ;;  %v654_v41 = vld [vmem:[%s1422_s30 + $0x38] sm:$0xff] (!%p945_p6) }
 0x2b3   : > { %1288 = vmatprep.subr.bf16.mxu0 (!%p945_p6), %v1287_v33  ;;  %1171 = vmatprep.mubr.f32.mxu0 (!%p945_p6), %v643_v39  ;;  %v759_v42 = vld [vmem:[%s1427_s9] sm:$0xff] (!%p945_p6)  ;;  %v760_v43 = vld [vmem:[%s1427_s9 + $0x8] sm:$0xff] (!%p945_p6)  ;;  %v761_v44 = vld [vmem:[%s1427_s9 + $0x10] sm:$0xff] (!%p945_p6)  ;;  %v1299_v48 = vpack.c.bf16 (!%p945_p6), %v654_v41, %v653_v40 }
 0x2b4   : > { %1290 = vmatpush3.bf16.msra.mxu0 (!%p945_p6), %v1287_v33  ;;  %v762_v45 = vld [vmem:[%s1427_s9 + $0x18] sm:$0xff] (!%p945_p6)  ;;  %v1319_v46 = vpack.c.bf16 (!%p945_p6), %v760_v43, %v759_v42  ;;  %v763_v49 = vld [vmem:[%s1427_s9 + $0x20] sm:$0xff] (!%p945_p6)  ;;  %v764_v50 = vld [vmem:[%s1427_s9 + $0x28] sm:$0xff] (!%p945_p6) }
 0x2b5   : > { %1292 = vmatprep.subr.bf16.mxu0 (!%p945_p6), %v1291_v35  ;;  %v1323_v47 = vpack.c.bf16 (!%p945_p6), %v762_v45, %v761_v44  ;;  %v655_v51 = vld [vmem:[%s1422_s30 + $0x40] sm:$0xff] (!%p945_p6)  ;;  %v656_v52 = vld [vmem:[%s1422_s30 + $0x48] sm:$0xff] (!%p945_p6)  ;;  %v1327_v53 = vpack.c.bf16 (!%p945_p6), %v764_v50, %v763_v49  ;;  %v765_v55 = vld [vmem:[%s1427_s9 + $0x30] sm:$0xff] (!%p945_p6) }
 0x2b6   : > { %1320 = vmatprep.subr.bf16.mxu1 (!%p945_p6), %v1319_v46  ;;  %v1303_v54 = vpack.c.bf16 (!%p945_p6), %v656_v52, %v655_v51  ;;  %v766_v56 = vld [vmem:[%s1427_s9 + $0x38] sm:$0xff] (!%p945_p6)  ;;  %v657_v57 = vld [vmem:[%s1422_s30 + $0x50] sm:$0xff] (!%p945_p6)  ;;  %v767_v61 = vld [vmem:[%s1427_s9 + $0x40] sm:$0xff] (!%p945_p6) }
 0x2b7   : > { %1322 = vmatpush3.bf16.msra.mxu1 (!%p945_p6), %v1319_v46  ;;  %v658_v58 = vld [vmem:[%s1422_s30 + $0x58] sm:$0xff] (!%p945_p6)  ;;  %v1331_v59 = vpack.c.bf16 (!%p945_p6), %v766_v56, %v765_v55  ;;  %v768_v62 = vld [vmem:[%s1427_s9 + $0x48] sm:$0xff] (!%p945_p6)  ;;  %v659_v63 = vld [vmem:[%s1422_s30 + $0x60] sm:$0xff] (!%p945_p6) }
 0x2b8   : > { %1294 = vmatpush3.bf16.msra.mxu0 %v1291_v35  ;;  %1324 = vmatprep.subr.bf16.mxu1 %v1323_v47  ;;  %v1307_v60 = vpack.c.bf16 %v658_v58, %v657_v57  ;;  %v660_v0 = vld [vmem:[%s1422_s30 + $0x68] sm:$0xff]  ;;  %v1335_v1 = vpack.c.bf16 %v768_v62, %v767_v61  ;;  %v769_v3 = vld [vmem:[%s1427_s9 + $0x50] sm:$0xff]  ;;  %v770_v4 = vld [vmem:[%s1427_s9 + $0x58] sm:$0xff] }
 0x2b9   : > { %1296 = vmatprep.subr.bf16.mxu0 %v1295_v38  ;;  %v1311_v2 = vpack.c.bf16 %v660_v0, %v659_v63  ;;  %v661_v5 = vld [vmem:[%s1422_s30 + $0x70] sm:$0xff]  ;;  %v662_v6 = vld [vmem:[%s1422_s30 + $0x78] sm:$0xff]  ;;  %v1339_v7 = vpack.c.bf16 %v770_v4, %v769_v3  ;;  %v771_v9 = vld [vmem:[%s1427_s9 + $0x60] sm:$0xff] }
 0x2ba   : > { %v1315_v8 = vpack.c.bf16 %v662_v6, %v661_v5  ;;  %v772_v10 = vld [vmem:[%s1427_s9 + $0x68] sm:$0xff]  ;;  %v645_v13 = vld [vmem:[#allocation2 + $0x10] sm:$0xff]  ;;  %v646_v14 = vld [vmem:[#allocation2 + $0x18] sm:$0xff] }
 0x2bb   : > { %1326 = vmatpush3.bf16.msra.mxu1 %v1323_v47  ;;  %v1343_v11 = vpack.c.bf16 %v772_v10, %v771_v9  ;;  %v644_v12 = vld [vmem:[#allocation2 + $0x8] sm:$0xff]  ;;  %v773_v15 = vld [vmem:[%s1427_s9 + $0x70] sm:$0xff]  ;;  %v774_v16 = vld [vmem:[%s1427_s9 + $0x78] sm:$0xff] }
 0x2bc   : > { %1298 = vmatpush3.bf16.msra.mxu0 %v1295_v38  ;;  %1328 = vmatprep.subr.bf16.mxu1 %v1327_v53  ;;  %v1347_v17 = vpack.c.bf16 %v774_v16, %v773_v15  ;;  %v946_v18 = vld [vmem:[%s1417_s27] ss:$0 sm:$0xff] }
 0x2bd   : > { %1300 = vmatprep.subr.bf16.mxu0 %v1299_v48  ;;  %v947_v31 = vld [vmem:[%s1432_s12] ss:$0 sm:$0xff] }
 0x2bf   : > { %1330 = vmatpush3.bf16.msra.mxu1 %v1327_v53 }
 0x2c0   : > { %1302 = vmatpush3.bf16.msra.mxu0 %v1299_v48  ;;  %1332 = vmatprep.subr.bf16.mxu1 %v1331_v59 }
 0x2c1   : > { %1304 = vmatprep.subr.bf16.mxu0 %v1303_v54 }
 0x2c3   : > { %1334 = vmatpush3.bf16.msra.mxu1 %v1331_v59 }
 0x2c4   : > { %1306 = vmatpush3.bf16.msra.mxu0 %v1303_v54  ;;  %1336 = vmatprep.subr.bf16.mxu1 %v1335_v1 }
 0x2c5   : > { %1308 = vmatprep.subr.bf16.mxu0 %v1307_v60 }
 0x2c7   : > { %1338 = vmatpush3.bf16.msra.mxu1 %v1335_v1 }
 0x2c8   : > { %1310 = vmatpush3.bf16.msra.mxu0 %v1307_v60  ;;  %1340 = vmatprep.subr.bf16.mxu1 %v1339_v7 }
 0x2c9   : > { %1312 = vmatprep.subr.bf16.mxu0 %v1311_v2 }
 0x2cb   : > { %1342 = vmatpush3.bf16.msra.mxu1 %v1339_v7 }
 0x2cc   : > { %1314 = vmatpush3.bf16.msra.mxu0 %v1311_v2  ;;  %1344 = vmatprep.subr.bf16.mxu1 %v1343_v11 }
 0x2cd   : > { %1316 = vmatprep.subr.bf16.mxu0 %v1315_v8 }
 0x2cf   : > { %1346 = vmatpush3.bf16.msra.mxu1 %v1343_v11 }
 0x2d0   : > { %1318 = vmatpush3.bf16.msra.mxu0 %v1315_v8  ;;  %1348 = vmatprep.subr.bf16.mxu1 %v1347_v17 }
 0x2d3   : > { %1172 = vmatmul.mubr.f32.vlgmr.msra.gmra.mrb[0].mxu0 %v644_v12  ;;  %1350 = vmatpush3.bf16.msra.mxu1 %v1347_v17 }
 0x2d4   : > { %1174 = vmatprep.mubr.f32.mxu0 %v645_v13 }
 0x2d7   : > { %1175 = vmatmul.mubr.f32.gmra.mrb[2].mxu0 %v646_v14 }
 0x3a6   : > { %v1173_v19 = vpop.f32.mrb[0].mxu0 }
 0x3a7   : > { %v742_v20 = vadd.f32 %v1173_v19, %v946_v18  ;;  %v736_v21 = vpop.f32.mrb[1].mxu0 }
 0x3a8   : > { %v737_v22 = vadd.f32 %v946_v18, %v736_v21 }
 0x3a9   : > { %v756_v25 = vmax.f32 %v742_v20, 0.0 }
 0x3aa   : > { %v1176_v23 = vpop.f32.mrb[2].mxu0  ;;  %v755_v24 = vmax.f32 %v737_v22, 0.0 }
 0x3ab   : > { %v752_v26 = vadd.f32 %v1176_v23, %v946_v18  ;;  %v746_v27 = vpop.f32.mrb[3].mxu0 }
 0x3ac   : > { %v747_v28 = vadd.f32 %v946_v18, %v746_v27  ;;  %1209 = vmatprep.mubr.f32.mxu1 %v755_v24 }
 0x3ad   : > { %1210 = vmatmul.mubr.f32.vlgmr.msra.gmra.mrb[0].mxu1 %v756_v25  ;;  %v758_v30 = vmax.f32 %v752_v26, 0.0 }
 0x3ae   : > { %v757_v29 = vmax.f32 %v747_v28, 0.0 }
 0x3b0   : > { %1212 = vmatprep.mubr.f32.mxu1 %v757_v29 }
 0x3b1   : > { %1213 = vmatmul.mubr.f32.gmra.mrb[2].mxu1 %v758_v30 }
 0x480   : > { %v1211_v32 = vpop.f32.mrb[0].mxu1 }
 0x481   : > { %v854_v33 = vadd.f32 %v1211_v32, %v947_v31  ;;  %v848_v34 = vpop.f32.mrb[1].mxu1 }
 0x482   : > { %v849_v35 = vadd.f32 %v947_v31, %v848_v34 }
 0x483   : > { %868 = vst [vmem:[%s1548_s6 + $0x8] sm:$0xff] %v854_v33 }
 0x484   : > { %867 = vst [vmem:[%s1548_s6] sm:$0xff] %v849_v35  ;;  %v1214_v36 = vpop.f32.mrb[2].mxu1 }
 0x485   : > { %v864_v37 = vadd.f32 %v1214_v36, %v947_v31  ;;  %v858_v38 = vpop.f32.mrb[3].mxu1 }
 0x486   : > { %v859_v39 = vadd.f32 %v947_v31, %v858_v38 }
 0x487   : > { %870 = vst [vmem:[%s1548_s6 + $0x18] sm:$0xff] %v864_v37 }
 0x488   : > { %869 = vst [vmem:[%s1548_s6 + $0x10] sm:$0xff] %v859_v39 }
 0x489 PF: > { %s16_s21 = sadd.s32 1, %s1365_s21  }
 0x48a   : > { %p13_p7 = scmp.ge.s32.totalorder %s16_s21, 5  }
 0x48c   :  { %15 = sbr.rel (!%p13_p7) target bundleno = 1 (0x1), region = 91 }

</bundles_post_ra>
